<compile_context>
chip_gen: v7x
topology: tpu7x:2x2x1
jax: 0.10.0
libtpu: 0.0.40
codegen_flags: <defaults>
</compile_context>

<pallas_src>
import functools

import jax
import jax.numpy as jnp
from jax.experimental import pallas as pl
from jax.experimental.pallas import tpu as pltpu

_LANE = 128


def _cdiv(a, b):
    return -(-a // b)


def _round_up(a, b):
    return ((a + b - 1) // b) * b


def _phys_vmem_bytes():
    """Best-effort physical VMEM query; fall back to 128 MiB (v5e/v6e)."""
    try:
        info = pltpu.get_tpu_info()
        for name in ("vmem_capacity_bytes", "vmem_size_bytes", "vmem_bytes"):
            v = getattr(info, name, None)
            if v:
                return int(v)
    except Exception:
        pass
    return 128 << 20


def _lane_fold(v):
    """(R, T) -> (R, 128): tree-sum of aligned 128-lane chunks (pure vreg adds)."""
    _, t = v.shape
    if t == _LANE:
        return v
    w = _LANE
    while t % (w * 2) == 0 and w * 2 < t:
        w *= 2
    acc = v[:, 0:w]
    for j in range(1, t // w):
        acc = acc + v[:, j * w:(j + 1) * w]
    return _lane_fold(acc)


def _make_kernel(C, t, S, S_g, G, rem, has_tail, has_oob):
    """Build the accumulation kernel for static tiling parameters."""

    def kernel(x_ref, lab_ref, ce_ref, inter_ref, ysum_ref, zsum_ref):
        p = pl.program_id(0)          # batch (x optional core-split) index
        s = pl.program_id(1)          # spatial tile index within this p-row

        @pl.when(s == 0)
        def _():
            ce_ref[...] = jnp.zeros_like(ce_ref)
            inter_ref[...] = jnp.zeros_like(inter_ref)
            ysum_ref[...] = jnp.zeros_like(ysum_ref)
            zsum_ref[...] = jnp.zeros_like(zsum_ref)

        # Flat spatial tile index (accounts for the core-split fold).
        flat = (p % G) * S_g + s if G > 1 else s

        def accumulate(masked):
            x = x_ref[0].astype(jnp.float32)                     # (C, T)
            lab = lab_ref[0]                                     # (1, T) int32
            cls = jax.lax.broadcasted_iota(jnp.int32, (C, 1), 0)  # class column
            hit = cls == lab                                     # (C, T) via broadcast
            if masked:
                # Static tail mask: lanes >= rem of the last tile are edge-block
                # garbage (Pallas does not zero-fill partial blocks).
                lane = jax.lax.broadcasted_iota(jnp.int32, (1, t), 1)
                valid = lane < rem                               # (1, T) bool
                x = jnp.where(valid, x, 0.0)
                hit = jnp.logical_and(hit, valid)

            onehot = hit.astype(jnp.float32)                     # (C, T)
            xo = jnp.where(hit, x, 0.0)                          # x * onehot

            # log-sum-exp over the class (sublane) axis.
            m = jnp.max(x, axis=0, keepdims=True)                                 # (1,T)
            lse = m + jnp.log(jnp.sum(jnp.exp(x - m), axis=0, keepdims=True))     # (1,T)
            if masked:
                lse = jnp.where(valid, lse, 0.0)

            # CE uses sum(lse) - sum(intersect)  (no per-pixel x[label] reduce).
            ce_ref[...] += _lane_fold(lse)[None]                 # (1, 1, 128)
            inter_ref[...] += _lane_fold(xo)[None]               # (1, C, 128)
            ysum_ref[...] += _lane_fold(onehot)[None]            # onehot**2 == onehot
            zsum_ref[...] += _lane_fold(x * x)[None]

        if has_tail:
            @pl.when(flat < S - 1)
            def _():
                accumulate(masked=False)

            @pl.when(flat == S - 1)
            def _():
                accumulate(masked=True)
            # flat >= S (core-split overhang): skip entirely.
        elif has_oob:
            @pl.when(flat < S)
            def _():
                accumulate(masked=False)
        else:
            accumulate(masked=False)

    return kernel


@functools.partial(jax.jit, static_argnames=("num_class", "alpha", "beta", "tile_hw"))
def dice_ce_loss_v2(inputs, target, *, num_class, alpha=0.5, beta=0.5, tile_hw=131072):
    """inputs: (N, C, H, W) float logits; target: (N, H, W) int class labels."""
    N, C, H, W = inputs.shape
    assert C == num_class
    HW = H * W

    # ---- generation-aware VMEM budget & lane-aligned spatial tile ----
    phys_vmem = _phys_vmem_bytes()
    vmem_limit = int(min(64 << 20, (phys_vmem * 3) // 4))   # 64 MiB v5e/v6e, 48 MiB v7x
    in_bytes = jnp.dtype(inputs.dtype).itemsize
    # double-buffered inputs + ~6 live f32 (C, t) temporaries in the body
    bytes_per_px = 2 * (C * in_bytes + 4) + 6 * C * 4
    t_cap = max(_LANE, ((int(vmem_limit * 0.6) // bytes_per_px) // _LANE) * _LANE)
    t_max = max(_LANE, min((tile_hw // _LANE) * _LANE, t_cap))

    # Pure reshapes of the native NCHW layout -- spatial axis (H*W) is the lane axis.
    x = inputs.reshape(N, C, HW)
    lab = target.reshape(N, 1, HW).astype(jnp.int32)

    if HW < _LANE:
        # Tiny spatial extent: negligible pad so a single 128-lane block covers the
        # array exactly; the in-kernel tail mask hides the padded lanes.
        x = jnp.pad(x, ((0, 0), (0, 0), (0, _LANE - HW)))
        lab = jnp.pad(lab, ((0, 0), (0, 0), (0, _LANE - HW)))
        t = _LANE
    else:
        hw_floor = (HW // _LANE) * _LANE           # largest lane-aligned width <= HW
        t = min(t_max, hw_floor)
        S0 = _cdiv(HW, t)
        t = _round_up(_cdiv(HW, S0), _LANE)        # rebalance; stays <= previous t
    S = _cdiv(HW, t)
    has_tail = (HW % t) != 0
    rem = HW - (S - 1) * t                         # valid lanes in the tail tile

    # ---- optional core-split so both v7x TensorCores see work when N is odd/1 ----
    G = 2 if (N % 2 == 1 and S >= 2) else 1
    S_g = _cdiv(S, G)
    has_oob = G * S_g > S
    NG = N * G

    if G > 1:
        def in_map(p, s):
            return (p // G, 0, jnp.minimum((p % G) * S_g + s, S - 1))
    else:
        def in_map(p, s):
            return (p, 0, s)

    def out_map(p, s):
        return (p, 0, 0)

    kernel = _make_kernel(C, t, S, S_g, G, rem, has_tail, has_oob)

    ce_p, inter_p, ysum_p, zsum_p = pl.pallas_call(
        kernel,
        out_shape=(
            jax.ShapeDtypeStruct((NG, 1, _LANE), jnp.float32),
            jax.ShapeDtypeStruct((NG, C, _LANE), jnp.float32),
            jax.ShapeDtypeStruct((NG, C, _LANE), jnp.float32),
            jax.ShapeDtypeStruct((NG, C, _LANE), jnp.float32),
        ),
        grid_spec=pltpu.PrefetchScalarGridSpec(
            num_scalar_prefetch=0,
            grid=(NG, S_g),
            in_specs=[
                pl.BlockSpec((1, C, t), in_map),
                pl.BlockSpec((1, 1, t), in_map),
            ],
            out_specs=[
                pl.BlockSpec((1, 1, _LANE), out_map),
                pl.BlockSpec((1, C, _LANE), out_map),
                pl.BlockSpec((1, C, _LANE), out_map),
                pl.BlockSpec((1, C, _LANE), out_map),
            ],
        ),
        compiler_params=pltpu.CompilerParams(
            dimension_semantics=("parallel", "arbitrary"),
            vmem_limit_bytes=vmem_limit,
        ),
    )(x, lab)

    # ---- tiny final combine (glue) ----
    # TODO(synk): labels could stream as int8/int16 and logits as bf16 to cut HBM
    # traffic once the producer allows it; the in-kernel f32 upcast already copes.
    P = N * HW
    inter = jnp.sum(inter_p, axis=(0, 2))                    # (C,)
    ce_loss = (jnp.sum(ce_p) - jnp.sum(inter)) / P           # CE = (sum lse - sum x[label]) / P
    ysum = jnp.sum(ysum_p, axis=(0, 2))
    zsum = jnp.sum(zsum_p, axis=(0, 2))
    smooth = 1e-5
    dice_per_class = 1.0 - (2.0 * inter + smooth) / (zsum + ysum + smooth)
    dice_loss = jnp.sum(dice_per_class) / num_class
    total_loss = alpha * ce_loss + beta * dice_loss
    return {"ce": ce_loss, "dice": dice_loss, "total": total_loss}


def _reference(inputs, target, num_class, alpha, beta):
    """Pure-JAX replica of the PyTorch forward for validation."""
    x = inputs.astype(jnp.float32)
    logp = jax.nn.log_softmax(x, axis=1)
    onehot = jax.nn.one_hot(target, num_class, axis=1, dtype=jnp.float32)   # (N,C,H,W)
    ce = -jnp.mean(jnp.sum(logp * onehot, axis=1))
    smooth = 1e-5
    dice_loss = 0.0
    for i in range(num_class):
        s = x[:, i]
        t = onehot[:, i]
        inter = jnp.sum(s * t)
        ysum = jnp.sum(t * t)
        zsum = jnp.sum(s * s)
        dice_loss += 1.0 - (2.0 * inter + smooth) / (zsum + ysum + smooth)
    dice_loss = dice_loss / num_class
    return {"ce": ce, "dice": dice_loss, "total": alpha * ce + beta * dice_loss}


if __name__ == "__main__":
    num_class, alpha, beta = 4, 0.5, 0.5
    key = jax.random.PRNGKey(0)
    k1, k2, k3, k4 = jax.random.split(key, 4)

    # Case 1: canonical small shape (N=2, C=4, 16x16); HW is a multiple of 128.
    inputs = jax.random.normal(k1, (2, num_class, 16, 16), dtype=jnp.float32)
    target = jax.random.randint(k2, (2, 16, 16), 0, num_class, dtype=jnp.int32)
    out = dice_ce_loss_v2(inputs, target, num_class=num_class, alpha=alpha, beta=beta)
    out = jax.tree_util.tree_map(jax.block_until_ready, out)
    ref = _reference(inputs, target, num_class, alpha, beta)
    for k in ("ce", "dice", "total"):
        assert jnp.allclose(out[k], ref[k], rtol=1e-4, atol=1e-5), (k, out[k], ref[k])

    # Case 2: ragged spatial extent (19x19), N=1 core-split fold, in-kernel tail mask.
    inputs2 = jax.random.normal(k3, (1, num_class, 19, 19), dtype=jnp.float32)
    target2 = jax.random.randint(k4, (1, 19, 19), 0, num_class, dtype=jnp.int32)
    out2 = dice_ce_loss_v2(inputs2, target2, num_class=num_class, alpha=alpha,
                           beta=beta, tile_hw=128)
    out2 = jax.tree_util.tree_map(jax.block_until_ready, out2)
    ref2 = _reference(inputs2, target2, num_class, alpha, beta)
    for k in ("ce", "dice", "total"):
        assert jnp.allclose(out2[k], ref2[k], rtol=1e-4, atol=1e-5), (k, out2[k], ref2[k])

    print("KERNEL_OK")
</pallas_src>

<mosaic_0001>
module attributes {stable_mosaic.version = 11 : i64} {
  func.func @kernel(%arg0: i32, %arg1: i32, %arg2: memref<1x4x256xf32, #tpu.memory_space<vmem>>, %arg3: memref<1x1x256xi32, #tpu.memory_space<vmem>>, %arg4: memref<1x1x128xf32, #tpu.memory_space<vmem>>, %arg5: memref<1x4x128xf32, #tpu.memory_space<vmem>>, %arg6: memref<1x4x128xf32, #tpu.memory_space<vmem>>, %arg7: memref<1x4x128xf32, #tpu.memory_space<vmem>>) attributes {dimension_semantics = [#tpu.dimension_semantics<parallel>, #tpu.dimension_semantics<arbitrary>], iteration_bounds = array<i64: 2, 1>, scalar_prefetch = 0 : i64, scratch_operands = 0 : i64, tpu.core_type = #tpu.core_type<tc>, window_params = [{transform_indices = @transform_0, window_bounds = array<i64: 1, 4, 256>}, {transform_indices = @transform_1, window_bounds = array<i64: 1, 1, 256>}, {transform_indices = @transform_2, window_bounds = array<i64: 1, 1, 128>}, {transform_indices = @transform_3, window_bounds = array<i64: 1, 4, 128>}, {transform_indices = @transform_4, window_bounds = array<i64: 1, 4, 128>}, {transform_indices = @transform_5, window_bounds = array<i64: 1, 4, 128>}]} {
    %c0_i32 = arith.constant 0 : i32
    %0 = arith.cmpi eq, %arg1, %c0_i32 : i32
    %1 = arith.extui %0 : i1 to i32
    %c0_i32_0 = arith.constant 0 : i32
    %2 = arith.cmpi ne, %1, %c0_i32_0 : i32
    scf.if %2 {
      %cst_32 = arith.constant 0.000000e+00 : f32
      %53 = vector.broadcast %cst_32 : f32 to vector<1x1x128xf32>
      %c0_33 = arith.constant 0 : index
      %c0_34 = arith.constant 0 : index
      %c0_35 = arith.constant 0 : index
      %54 = vector.load %arg4[%c0_33, %c0_34, %c0_35] : memref<1x1x128xf32, #tpu.memory_space<vmem>>, vector<1x1x128xf32>
      tpu.vector_store %arg4[%c0_33, %c0_34, %c0_35], %53 {strides = array<i32>} : memref<1x1x128xf32, #tpu.memory_space<vmem>>, vector<1x1x128xf32>,
      %cst_36 = arith.constant 0.000000e+00 : f32
      %55 = vector.broadcast %cst_36 : f32 to vector<1x4x128xf32>
      %c0_37 = arith.constant 0 : index
      %c0_38 = arith.constant 0 : index
      %c0_39 = arith.constant 0 : index
      %56 = vector.load %arg5[%c0_37, %c0_38, %c0_39] : memref<1x4x128xf32, #tpu.memory_space<vmem>>, vector<1x4x128xf32>
      tpu.vector_store %arg5[%c0_37, %c0_38, %c0_39], %55 {strides = array<i32>} : memref<1x4x128xf32, #tpu.memory_space<vmem>>, vector<1x4x128xf32>,
      %cst_40 = arith.constant 0.000000e+00 : f32
      %57 = vector.broadcast %cst_40 : f32 to vector<1x4x128xf32>
      %c0_41 = arith.constant 0 : index
      %c0_42 = arith.constant 0 : index
      %c0_43 = arith.constant 0 : index
      %58 = vector.load %arg6[%c0_41, %c0_42, %c0_43] : memref<1x4x128xf32, #tpu.memory_space<vmem>>, vector<1x4x128xf32>
      tpu.vector_store %arg6[%c0_41, %c0_42, %c0_43], %57 {strides = array<i32>} : memref<1x4x128xf32, #tpu.memory_space<vmem>>, vector<1x4x128xf32>,
      %cst_44 = arith.constant 0.000000e+00 : f32
      %59 = vector.broadcast %cst_44 : f32 to vector<1x4x128xf32>
      %c0_45 = arith.constant 0 : index
      %c0_46 = arith.constant 0 : index
      %c0_47 = arith.constant 0 : index
      %60 = vector.load %arg7[%c0_45, %c0_46, %c0_47] : memref<1x4x128xf32, #tpu.memory_space<vmem>>, vector<1x4x128xf32>
      tpu.vector_store %arg7[%c0_45, %c0_46, %c0_47], %59 {strides = array<i32>} : memref<1x4x128xf32, #tpu.memory_space<vmem>>, vector<1x4x128xf32>,
    } else {
    }
    %c0 = arith.constant 0 : index
    %c0_1 = arith.constant 0 : index
    %c0_2 = arith.constant 0 : index
    %3 = vector.load %arg2[%c0, %c0_1, %c0_2] : memref<1x4x256xf32, #tpu.memory_space<vmem>>, vector<1x4x256xf32>
    %4 = vector.shape_cast %3 : vector<1x4x256xf32> to vector<4x256xf32>
    %c0_3 = arith.constant 0 : index
    %c0_4 = arith.constant 0 : index
    %c0_5 = arith.constant 0 : index
    %5 = vector.load %arg3[%c0_3, %c0_4, %c0_5] : memref<1x1x256xi32, #tpu.memory_space<vmem>>, vector<1x1x256xi32>
    %6 = vector.shape_cast %5 : vector<1x1x256xi32> to vector<1x256xi32>
    %7 = tpu.iota {dimensions = array<i32: 0>} : vector<4x1xi32>
    %8 = vector.broadcast %7 : vector<4x1xi32> to vector<4x256xi32>
    %9 = vector.broadcast %6 : vector<1x256xi32> to vector<4x256xi32>
    %10 = arith.cmpi eq, %8, %9 : vector<4x256xi32>
    %11 = arith.extui %10 : vector<4x256xi1> to vector<4x256xi32>
    %12 = arith.sitofp %11 : vector<4x256xi32> to vector<4x256xf32>
    %cst = arith.constant 0.000000e+00 : f32
    %13 = vector.broadcast %cst : f32 to vector<4x256xf32>
    %14 = arith.select %10, %4, %13 : vector<4x256xi1>, vector<4x256xf32>
    %cst_6 = arith.constant dense<0xFF800000> : vector<256xf32>
    %15 = vector.multi_reduction <maximumf>, %4, %cst_6 [0] : vector<4x256xf32> to vector<256xf32>
    %16 = vector.shape_cast %15 : vector<256xf32> to vector<1x256xf32>
    %17 = vector.broadcast %16 : vector<1x256xf32> to vector<4x256xf32>
    %18 = arith.subf %4, %17 : vector<4x256xf32>
    %19 = math.exp %18 : vector<4x256xf32>
    %cst_7 = arith.constant dense<0.000000e+00> : vector<256xf32>
    %20 = vector.multi_reduction <add>, %19, %cst_7 [0] : vector<4x256xf32> to vector<256xf32>
    %21 = vector.shape_cast %20 : vector<256xf32> to vector<1x256xf32>
    %22 = math.log %21 : vector<1x256xf32>
    %23 = arith.addf %16, %22 : vector<1x256xf32>
    %c0_8 = arith.constant 0 : index
    %c0_9 = arith.constant 0 : index
    %c0_10 = arith.constant 0 : index
    %24 = vector.load %arg4[%c0_8, %c0_9, %c0_10] : memref<1x1x128xf32, #tpu.memory_space<vmem>>, vector<1x1x128xf32>
    %25 = vector.extract_strided_slice %23 {offsets = [0, 0], sizes = [1, 128], strides = [1, 1]} : vector<1x256xf32> to vector<1x128xf32>
    %26 = vector.extract_strided_slice %23 {offsets = [0, 128], sizes = [1, 128], strides = [1, 1]} : vector<1x256xf32> to vector<1x128xf32>
    %27 = arith.addf %25, %26 : vector<1x128xf32>
    %28 = vector.shape_cast %27 : vector<1x128xf32> to vector<1x1x128xf32>
    %29 = arith.addf %24, %28 : vector<1x1x128xf32>
    %c0_11 = arith.constant 0 : index
    %c0_12 = arith.constant 0 : index
    %c0_13 = arith.constant 0 : index
    %30 = vector.load %arg4[%c0_11, %c0_12, %c0_13] : memref<1x1x128xf32, #tpu.memory_space<vmem>>, vector<1x1x128xf32>
    tpu.vector_store %arg4[%c0_11, %c0_12, %c0_13], %29 {strides = array<i32>} : memref<1x1x128xf32, #tpu.memory_space<vmem>>, vector<1x1x128xf32>,
    %c0_14 = arith.constant 0 : index
    %c0_15 = arith.constant 0 : index
    %c0_16 = arith.constant 0 : index
    %31 = vector.load %arg5[%c0_14, %c0_15, %c0_16] : memref<1x4x128xf32, #tpu.memory_space<vmem>>, vector<1x4x128xf32>
    %32 = vector.extract_strided_slice %14 {offsets = [0, 0], sizes = [4, 128], strides = [1, 1]} : vector<4x256xf32> to vector<4x128xf32>
    %33 = vector.extract_strided_slice %14 {offsets = [0, 128], sizes = [4, 128], strides = [1, 1]} : vector<4x256xf32> to vector<4x128xf32>
    %34 = arith.addf %32, %33 : vector<4x128xf32>
    %35 = vector.shape_cast %34 : vector<4x128xf32> to vector<1x4x128xf32>
    %36 = arith.addf %31, %35 : vector<1x4x128xf32>
    %c0_17 = arith.constant 0 : index
    %c0_18 = arith.constant 0 : index
    %c0_19 = arith.constant 0 : index
    %37 = vector.load %arg5[%c0_17, %c0_18, %c0_19] : memref<1x4x128xf32, #tpu.memory_space<vmem>>, vector<1x4x128xf32>
    tpu.vector_store %arg5[%c0_17, %c0_18, %c0_19], %36 {strides = array<i32>} : memref<1x4x128xf32, #tpu.memory_space<vmem>>, vector<1x4x128xf32>,
    %c0_20 = arith.constant 0 : index
    %c0_21 = arith.constant 0 : index
    %c0_22 = arith.constant 0 : index
    %38 = vector.load %arg6[%c0_20, %c0_21, %c0_22] : memref<1x4x128xf32, #tpu.memory_space<vmem>>, vector<1x4x128xf32>
    %39 = vector.extract_strided_slice %12 {offsets = [0, 0], sizes = [4, 128], strides = [1, 1]} : vector<4x256xf32> to vector<4x128xf32>
    %40 = vector.extract_strided_slice %12 {offsets = [0, 128], sizes = [4, 128], strides = [1, 1]} : vector<4x256xf32> to vector<4x128xf32>
    %41 = arith.addf %39, %40 : vector<4x128xf32>
    %42 = vector.shape_cast %41 : vector<4x128xf32> to vector<1x4x128xf32>
    %43 = arith.addf %38, %42 : vector<1x4x128xf32>
    %c0_23 = arith.constant 0 : index
    %c0_24 = arith.constant 0 : index
    %c0_25 = arith.constant 0 : index
    %44 = vector.load %arg6[%c0_23, %c0_24, %c0_25] : memref<1x4x128xf32, #tpu.memory_space<vmem>>, vector<1x4x128xf32>
    tpu.vector_store %arg6[%c0_23, %c0_24, %c0_25], %43 {strides = array<i32>} : memref<1x4x128xf32, #tpu.memory_space<vmem>>, vector<1x4x128xf32>,
    %c0_26 = arith.constant 0 : index
    %c0_27 = arith.constant 0 : index
    %c0_28 = arith.constant 0 : index
    %45 = vector.load %arg7[%c0_26, %c0_27, %c0_28] : memref<1x4x128xf32, #tpu.memory_space<vmem>>, vector<1x4x128xf32>
    %46 = arith.mulf %4, %4 : vector<4x256xf32>
    %47 = vector.extract_strided_slice %46 {offsets = [0, 0], sizes = [4, 128], strides = [1, 1]} : vector<4x256xf32> to vector<4x128xf32>
    %48 = vector.extract_strided_slice %46 {offsets = [0, 128], sizes = [4, 128], strides = [1, 1]} : vector<4x256xf32> to vector<4x128xf32>
    %49 = arith.addf %47, %48 : vector<4x128xf32>
    %50 = vector.shape_cast %49 : vector<4x128xf32> to vector<1x4x128xf32>
    %51 = arith.addf %45, %50 : vector<1x4x128xf32>
    %c0_29 = arith.constant 0 : index
    %c0_30 = arith.constant 0 : index
    %c0_31 = arith.constant 0 : index
    %52 = vector.load %arg7[%c0_29, %c0_30, %c0_31] : memref<1x4x128xf32, #tpu.memory_space<vmem>>, vector<1x4x128xf32>
    tpu.vector_store %arg7[%c0_29, %c0_30, %c0_31], %51 {strides = array<i32>} : memref<1x4x128xf32, #tpu.memory_space<vmem>>, vector<1x4x128xf32>,
    return
  }
  func.func @transform_0(%arg0: i32, %arg1: i32) -> (i32, i32, i32) {
    %c0_i32 = arith.constant 0 : i32
    %c0_i32_0 = arith.constant 0 : i32
    return %arg0, %c0_i32, %arg1 : i32, i32, i32
  }
  func.func @transform_1(%arg0: i32, %arg1: i32) -> (i32, i32, i32) {
    %c0_i32 = arith.constant 0 : i32
    %c0_i32_0 = arith.constant 0 : i32
    return %arg0, %c0_i32, %arg1 : i32, i32, i32
  }
  func.func @transform_2(%arg0: i32, %arg1: i32) -> (i32, i32, i32) {
    %c0_i32 = arith.constant 0 : i32
    %c0_i32_0 = arith.constant 0 : i32
    %c0_i32_1 = arith.constant 0 : i32
    return %arg0, %c0_i32, %c0_i32_0 : i32, i32, i32
  }
  func.func @transform_3(%arg0: i32, %arg1: i32) -> (i32, i32, i32) {
    %c0_i32 = arith.constant 0 : i32
    %c0_i32_0 = arith.constant 0 : i32
    %c0_i32_1 = arith.constant 0 : i32
    return %arg0, %c0_i32, %c0_i32_0 : i32, i32, i32
  }
  func.func @transform_4(%arg0: i32, %arg1: i32) -> (i32, i32, i32) {
    %c0_i32 = arith.constant 0 : i32
    %c0_i32_0 = arith.constant 0 : i32
    %c0_i32_1 = arith.constant 0 : i32
    return %arg0, %c0_i32, %c0_i32_0 : i32, i32, i32
  }
  func.func @transform_5(%arg0: i32, %arg1: i32) -> (i32, i32, i32) {
    %c0_i32 = arith.constant 0 : i32
    %c0_i32_0 = arith.constant 0 : i32
    %c0_i32_1 = arith.constant 0 : i32
    return %arg0, %c0_i32, %c0_i32_0 : i32, i32, i32
  }
}

</mosaic_0001>

<bundles_post_ra>
// kernel: dice_ce_loss_v2.1
= control target key start
LH: loop header
LB: loop body
LE: loop exit
PB: predicated region body
PF: predicated region fallthrough
CT: control target
= control target key end

     0   :  { %s1446_s0 = inlined_call_operand.hbm [shape: f32[2,4,256], index: 0, kind: input, shape index: {}]   ;;  %s1447_s1 = inlined_call_operand.hbm [shape: s32[2,1,256], index: 1, kind: input, shape index: {}]   ;;  %s1448_s2 = inlined_call_operand.hbm [shape: f32[2,1,128], index: 2, kind: output, shape index: {0}]   ;;  %s1449_s3 = inlined_call_operand.hbm [shape: f32[2,4,128], index: 3, kind: output, shape index: {1}]   ;;  %s1450_s4 = inlined_call_operand.hbm [shape: f32[2,4,128], index: 4, kind: output, shape index: {2}]   ;;  %s1451_s5 = inlined_call_operand.hbm [shape: f32[2,4,128], index: 5, kind: output, shape index: {3}]  }
   0x1   :  { %1457 = sst [smem:[#allocation20_spill]] %s1446_s0 }
   0x2   :  { %1458 = sst [smem:[#allocation21_spill]] %s1447_s1 }
   0x3   :  { %11 = vsyncpa [#allocation3], 0 }
   0x4   :  { %13 = vsyncpa [#allocation3 + $0x1], 0 }
   0x5   :  { %14 = vsyncpa [#allocation6], 0 }
   0x6   :  { %16 = vsyncpa [#allocation6 + $0x1], 0 }
   0x7   :  { %17 = vsyncpa [#allocation4], 0 }
   0x8   :  { %19 = vsyncpa [#allocation4 + $0x1], 0 }
   0x9   :  { %20 = vsyncpa [#allocation9], 0 }
   0xa   :  { %22 = vsyncpa [#allocation9 + $0x1], 0 }
   0xb   :  { %23 = vsyncpa [#allocation12], 0 }
   0xc   :  { %25 = vsyncpa [#allocation12 + $0x1], 0  ;;  %s1083_s18 = smov 0   ;;  %s1085_s19 = smov 0  }
   0xd   :  { %s1087_s20 = smov 0   ;;  %s1089_s21 = smov 0  }
   0xe   :  { %s1091_s22 = smov 0   ;;  %s1093_s23 = smov 0  }
   0xf LB: > { %1459 = sst [smem:[#allocation18_spill]] %s1040_s22  ;;  %s1114_s24 = sadd.s32 4294967295, %s1044_s23   ;;  %s1044_s23 = sphi %s1093_s23, %s31_s23   ;;  %s1040_s22 = sphi %s1091_s22, %s1479_s22   ;;  %s1036_s21 = sphi %s1089_s21, %s1478_s21   ;;  %s1032_s20 = sphi %s1087_s20, %s1482_s20   ;;  %s1028_s19 = sphi %s1085_s19, %s1481_s19   ;;  %s1024_s18 = sphi %s1083_s18, %s1480_s18  }
  0x10   : > { %s1453_s25 = sadd.s32 4294967294, %s1044_s23   ;;  %s43_s26 = sadd.s32 1, %s1040_s22 }
  0x11   : > { %s52_s27 = sadd.s32 1, %s1032_s20  ;;  %p45_p0 = scmp.ge.s32.totalorder %s43_s26, 2 }
  0x12   : > { %p59_p1 = scmp.ne.s32.totalorder %s1032_s20, %s1028_s19  ;;  %p60_p2 = scmp.eq.s32.totalorder %s1044_s23, 0 }
  0x13   : > { %p65_p3 = scmp.ne.s32.totalorder %s1028_s19, %s1024_s18  ;;  %s1484_s26 = smov (%p45_p0, %s43_s26), 0 }
  0x14   : > { %1460 = sst [smem:[#allocation19_spill]] %s1484_s26  ;;  %p1126_p4 = por %p60_p2, %p59_p1 }
  0x15   : > { %p66_p5 = scmp.eq.s32.totalorder %s1114_s24, 0  ;;  %s47_s29 = ssub.s32 %s1040_s22, %s1484_s26 }
  0x16   : > { %p117_p6 = scmp.eq.s32.totalorder %s1114_s24, 1  ;;  %p50_p7 = scmp.eq.s32.totalorder %s47_s29, 0 }
  0x17   : > { %p1134_p8 = por %p66_p5, %p65_p3  ;;  %p123_p10 = scmp.eq.s32.totalorder %s1453_s25, 1 }
  0x18   : > { %p1138_p9 = por %p117_p6, %p59_p1  ;;  %p748_p13 = scmp.lt.s32.totalorder %s1044_s23, 2 }
  0x19   : > { %s1462_s30 = scalar_select %p1134_p8, 1, 0 }
  0x1a   : > { %s1463_s6 = scalar_select %p1138_p9, 1, 0 }
  0x1b   : > { %s1145_s7 = scalar_select %p50_p7, %s1032_s20, %s52_s27  }
  0x1c   : > { %p1147_p11 = por %p123_p10, %p65_p3  ;;  %s1154_s9 = sand.u32 1, %s1032_s20  }
  0x1d   : > { %s691_s10 = sshll.u32 %s1154_s9, 3  ;;  %s714_s11 = sshll.u32 %s1040_s22, 7 }
  0x1e   : > { %s1464_s8 = scalar_select %p1147_p11, 1, 0 }
  0x1f   : > { %s1465_s0 = sld [smem:[#allocation20_spill]]  ;;  %s225_s15 = scalar_lea.vmem [#allocation2], %s691_s10 }
  0x20   : > { %s235_s16 = sshll.u32 %s225_s15, 4  ;;  %p1167_p0 = pnand %p748_p13, %p1126_p4  ;;  %s1163_s16 = int_to_ptr.vmem [resolvable:$true] %s235_s16 }
  0x21   : > { %s222_s27 = scalar_lea.sflag [#allocation3], %s1154_s9 }
  0x22   : > { %p808_p5 = pneg %p1167_p0 }
  0x25   : > { %s1161_s14 = scalar_lea.hbm %s1465_s0, %s714_s11  ;;  %s811_s28 = scalar_lea.hbm %s1465_s0, 256 }
  0x26   : > { %s806_s29 = scalar_lea.hbm %s1161_s14, 128  ;;  %p812_p4 = scmp.lt.u32.totalorder %s1161_s14, %s1465_s0 }
  0x27   : > { %p807_p3 = scmp.ne.s32.totalorder %s1161_s14, %s806_s29  ;;  %p813_p10 = scmp.lt.u32.totalorder %s811_s28, %s806_s29 }
  0x28   : > { %p815_p12 = scmp.lt.u32.totalorder %s806_s29, %s1161_s14 }
  0x29   : > { %p809_p6 = pnand %p808_p5, %p807_p3  ;;  %p814_p13 = por %p813_p10, %p812_p4 }
  0x2b   : > { %p810_p7 = pneg %p809_p6  ;;  %p816_p1 = por %p815_p12, %p814_p13 }
  0x2d   : > { %p817_p2 = pnand %p816_p1, %p810_p7 }
  0x2f   : > { %820 = shalt.err (!%p817_p2)
}
  0x30   : > { %s821_s15 = scalar_lea.vmem %s1163_s16, 128  ;;  %s1046_s10 = smov [#allocation2]  }
  0x31   : > { %p822_p3 = scmp.ne.s32.totalorder %s1163_s16, %s821_s15  ;;  %s826_s11 = sshll.u32 %s1046_s10, 4  ;;  %s827_s11 = int_to_ptr.vmem [resolvable:$false] %s826_s11 }
  0x32   : > { %s828_s12 = scalar_lea.vmem %s827_s11, 256  ;;  %p829_p9 = scmp.lt.s32.totalorder %s1163_s16, %s827_s11 }
  0x33   : > { %p824_p6 = pnand %p822_p3, %p808_p5  ;;  %p830_p4 = scmp.lt.s32.totalorder %s828_s12, %s821_s15 }
  0x35   : > { %p825_p11 = pneg %p824_p6  ;;  %p831_p10 = por %p830_p4, %p829_p9 }
  0x37   : > { %p832_p12 = pnand %p831_p10, %p825_p11 }
  0x39   : > { %835 = shalt.err (!%p832_p12)
}
  0x3a   : > { %731 = dma.hbm_to_vmem [thread:$0]  (!%p1167_p0), %s1161_s14, 128, %s1163_s16, %s222_s27  }
  0x3b   : > { %p1467_p1 = scmp.lt.s32.totalorder %s1044_s23, 3  ;;  %p1468_p2 = scmp.ge.s32.totalorder %s1044_s23, 1 }
  0x3c   : > { %s694_s28 = sshll.u32 %s1154_s9, 1  ;;  %s715_s13 = sshll.u32 %s1040_s22, 5 }
  0x3d   : > { %p1203_p7 = pnand %p1468_p2, %p1467_p1  ;;  %s1470_s1 = sld [smem:[#allocation21_spill]] }
  0x3e   : > { %s246_s12 = scalar_lea.vmem [#allocation5], %s694_s28  ;;  %s243_s14 = scalar_lea.sflag [#allocation6], %s1154_s9 }
  0x3f   : > { %s1469_s29 = scalar_select %p1203_p7, 1, 0 }
  0x40   : > { %s256_s25 = sshll.u32 %s246_s12, 4  ;;  %s257_s25 = int_to_ptr.vmem [resolvable:$true] %s256_s25 }
  0x43   : > { %s1212_s11 = scalar_lea.hbm %s1470_s1, %s715_s13  ;;  %s841_s15 = scalar_lea.hbm %s1470_s1, 64 }
  0x44   : > { %s836_s16 = scalar_lea.hbm %s1212_s11, 32  ;;  %p842_p3 = scmp.lt.u32.totalorder %s1212_s11, %s1470_s1 }
  0x45   : > { %p837_p9 = scmp.ne.s32.totalorder %s1212_s11, %s836_s16  ;;  %p843_p6 = scmp.lt.u32.totalorder %s841_s15, %s836_s16 }
  0x46   : > { %p845_p10 = scmp.lt.u32.totalorder %s836_s16, %s1212_s11 }
  0x47   : > { %p839_p11 = pnand %p837_p9, %p808_p5  ;;  %p844_p4 = por %p843_p6, %p842_p3 }
  0x49   : > { %p840_p13 = pneg %p839_p11  ;;  %p846_p12 = por %p845_p10, %p844_p4 }
  0x4b   : > { %p847_p1 = pnand %p846_p12, %p840_p13 }
  0x4d   : > { %850 = shalt.err (!%p847_p1)
}
  0x4e   : > { %s851_s9 = scalar_lea.vmem %s257_s25, 32  ;;  %s1047_s28 = smov [#allocation5]  }
  0x4f   : > { %p852_p2 = scmp.ne.s32.totalorder %s257_s25, %s851_s9  ;;  %s856_s0 = sshll.u32 %s1047_s28, 4  ;;  %s857_s0 = int_to_ptr.vmem [resolvable:$false] %s856_s0 }
  0x50   : > { %s858_s12 = scalar_lea.vmem %s857_s0, 64  ;;  %p859_p8 = scmp.lt.s32.totalorder %s257_s25, %s857_s0 }
  0x51   : > { %p854_p9 = pnand %p852_p2, %p808_p5  ;;  %p860_p7 = scmp.lt.s32.totalorder %s858_s12, %s851_s9 }
  0x53   : > { %p855_p11 = pneg %p854_p9  ;;  %p861_p3 = por %p860_p7, %p859_p8 }
  0x55   : > { %p862_p6 = pnand %p861_p3, %p855_p11 }
  0x57   : > { %865 = shalt.err (!%p862_p6)
}
  0x58   : > { %734 = dma.hbm_to_vmem [thread:$0]  (!%p1167_p0), %s1212_s11, 32, %s257_s25, %s243_s14  }
  0x59   : > { %p1471_p13 = scmp.ne.s32.totalorder %s1469_s29, 0 }
  0x5a   : > { %s1237_s16 = sand.u32 (!%p1471_p13), 1, %s1028_s19   ;;  %p1472_p5 = scmp.ne.s32.totalorder (!%p1471_p13), %s1462_s30, 0 }
  0x5b   : > { %265 = sbr.rel (%p1471_p13) target bundleno = 249 (0xf9), region = 28  ;;  %s698_s27 = sshll.u32 (!%p1471_p13), %s1237_s16, 3 }
  0x5c   : > { %s268_s15 = scalar_lea.sflag (!%p1471_p13), [#allocation3], %s1237_s16  ;;  %s271_s13 = scalar_lea.vmem (!%p1471_p13), [#allocation2], %s698_s27 }
  0x62   : > { %1003 = dma.done.wait (%p1472_p5), %s268_s15, 128  }
  0x63   : > { %1005 = vsyncadd (%p1472_p5), %s268_s15, 4294967168  ;;  %s699_s25 = sshll.u32 %s1237_s16, 1  ;;  %s277_s17 = scalar_lea.sflag [#allocation6], %s1237_s16 }
  0x64   : > { %s280_s29 = scalar_lea.vmem [#allocation5], %s699_s25 }
  0x65   : > { %1007 = dma.done.wait (%p1472_p5), %s277_s17, 32  }
  0x66   : > { %1009 = vsyncadd (%p1472_p5), %s277_s17, 4294967264  ;;  %s700_s11 = sshll.u32 %s1237_s16, 2  ;;  %v338_v0 = vlaneseq  ;;  %s1253_s14 = scalar_lea.vmem [#allocation7], %s1237_s16  ;;  %v1048_v1 = vmov 0.0   ;;  %vm359_vm0 = vcmask 1043456   ;;  %v1265_v5 = vld [vmem:[%s271_s13] sm:$0xff] }
  0x67   : > { %332 = vst [vmem:[%s1253_s14] sm:$0x1] %v1048_v1  ;;  %s1256_s10 = scalar_lea.vmem [#allocation8], %s700_s11  ;;  %s1259_s9 = scalar_lea.vmem [#allocation10], %s700_s11  ;;  %v337_v6 = vld [vmem:[%s280_s29] sm:$0x3]  ;;  %v355_v9 = vcombine.high %v1265_v5, %v1265_v5  ;;  %v360_v10 = vsel %vm359_vm0, %v1265_v5, -inf  ;;  %v417_v12 = vmul.f32 %v1265_v5, %v1265_v5 }
  0x68   : > { %333 = vst [vmem:[%s1256_s10] sm:$0xf] %v1048_v1  ;;  %334 = vst [vmem:[%s1259_s9] sm:$0xf] %v1048_v1  ;;  %v339_v2 = vshrl.u32 %v338_v0, 7  ;;  %s1262_s30 = scalar_lea.vmem [#allocation11], %s700_s11  ;;  %s478_s28 = sshll.u32 %s1259_s9, 4  ;;  %v361_v11 = vrot.slane %v360_v10, 4  ;;  %s1280_s28 = int_to_ptr.vmem [resolvable:$true] %s478_s28 }
  0x69   : > { %335 = vst [vmem:[%s1262_s30] sm:$0xf] %v1048_v1  ;;  %v367_v13 = vsel %vm359_vm0, %v355_v9, -inf  ;;  %s709_s12 = sshll.u32 %s1036_s21, 6  ;;  %s465_s27 = sshll.u32 %s1256_s10, 4  ;;  %v419_v23 = vrot.slane %v417_v12, 4  ;;  %s1290_s27 = int_to_ptr.vmem [resolvable:$true] %s465_s27 }
  0x6a   : > { %v342_v3 = vsub.s32 0, %v339_v2  ;;  %v346_v4 = vsub.s32 1, %v339_v2  ;;  %v368_v16 = vrot.slane %v367_v13, 4  ;;  %v362_v18 = vmax.f32 %v360_v10, %v361_v11  ;;  %s491_s15 = sshll.u32 %s1262_s30, 4  ;;  %s1288_s17 = scalar_lea.hbm %s1449_s3, %s709_s12  ;;  %s1305_s15 = int_to_ptr.vmem [resolvable:$true] %s491_s15 }
  0x6b   : > { %v421_v29 = vadd.f32 %v419_v23, %v417_v12  ;;  %s1297_s0 = scalar_lea.hbm %s1450_s4, %s709_s12  ;;  %s1303_s1 = scalar_lea.hbm %s1451_s5, %s709_s12 }
  0x6c   : > { %v343_v7 = vrot.slane %v337_v6, %v342_v3  ;;  %v347_v8 = vrot.slane %v337_v6, %v346_v4  ;;  %v369_v24 = vmax.f32 %v367_v13, %v368_v16  ;;  %v363_v25 = vrot.slane %v362_v18, 2  ;;  %s1473_s26 = sand.u32 1, %s1114_s24   ;;  %s866_s29 = scalar_lea.vmem %s1290_s27, 64 }
  0x6d   : > { %s1313_s22 = scalar_lea.sflag [#allocation9], %s1473_s26  ;;  %p867_p8 = scmp.ne.s32.totalorder %s1290_s27, %s866_s29 }
  0x6e   : > { %vm348_vm1 = vcmp.eq.s32.totalorder %v339_v2, %v343_v7  ;;  %vm349_vm2 = vcmp.eq.s32.totalorder %v339_v2, %v347_v8  ;;  %v1292_v30 = vmax.f32 %v362_v18, %v363_v25  ;;  %v370_v31 = vrot.slane %v369_v24, 2  ;;  %p1474_p0 = scmp.ne.s32.totalorder %s1463_s6, 0 }
  0x6f   : > { %v357_v14 = vsel %vm348_vm1, %v1265_v5, 0.0  ;;  %v358_v15 = vsel %vm349_vm2, %v355_v9, 0.0  ;;  %v408_v17 = vld [vmem:[%s1256_s10] sm:$0xf]  ;;  %v703_v20 = vsel %vm348_vm1, 1.0, %v1048_v1  ;;  %v704_v21 = vsel %vm349_vm2, 1.0, %v1048_v1 }
  0x70   : > { %v409_v19 = vadd.f32 %v358_v15, %v357_v14  ;;  %v412_v22 = vld [vmem:[%s1259_s9] sm:$0xf]  ;;  %v413_v26 = vadd.f32 %v704_v21, %v703_v20  ;;  %v416_v27 = vld [vmem:[%s1262_s30] sm:$0xf]  ;;  %v365_v34 = vrot.slane %v1292_v30, 1  ;;  %v1308_v35 = vmax.f32 %v369_v24, %v370_v31  ;;  %p868_p7 = pnand %p867_p8, %p1474_p0 }
  0x71   : > { %v422_v33 = vadd.f32 %v421_v29, %v416_v27 }
  0x72   : > { %v410_v28 = vadd.f32 %v409_v19, %v408_v17  ;;  %v414_v32 = vadd.f32 %v413_v26, %v412_v22  ;;  %p869_p4 = pneg %p868_p7 }
  0x74   : > { %411 = vst [vmem:[%s1256_s10] sm:$0xf] %v410_v28  ;;  %415 = vst [vmem:[%s1259_s9] sm:$0xf] %v414_v32  ;;  %s1049_s10 = smov [#allocation8]  }
  0x75   : > { %s870_s11 = sshll.u32 %s1049_s10, 4  ;;  %s871_s11 = int_to_ptr.vmem [resolvable:$false] %s870_s11 }
  0x76   : > { %s872_s12 = scalar_lea.vmem %s871_s11, 128  ;;  %p873_p10 = scmp.lt.s32.totalorder %s1290_s27, %s871_s11 }
  0x77   : > { %p874_p12 = scmp.lt.s32.totalorder %s872_s12, %s866_s29 }
  0x79   : > { %p875_p1 = por %p874_p12, %p873_p10 }
  0x7b   : > { %p876_p2 = pnand %p875_p1, %p869_p4 }
  0x7d   : > { %879 = shalt.err (!%p876_p2)
}
  0x7e   : > { %s880_s24 = scalar_lea.hbm %s1288_s17, 64  ;;  %s884_s13 = scalar_lea.hbm %s1449_s3, 128 }
  0x7f   : > { %p881_p9 = scmp.ne.s32.totalorder %s1288_s17, %s880_s24  ;;  %p885_p6 = scmp.lt.u32.totalorder %s1288_s17, %s1449_s3 }
  0x80   : > { %p886_p13 = scmp.lt.u32.totalorder %s884_s13, %s880_s24  ;;  %p888_p8 = scmp.lt.u32.totalorder %s880_s24, %s1288_s17 }
  0x81   : > { %p882_p11 = pnand %p881_p9, %p1474_p0 }
  0x82   : > { %p887_p5 = por %p886_p13, %p885_p6 }
  0x83   : > { %p883_p3 = pneg %p882_p11 }
  0x84   : > { %p889_p7 = por %p888_p8, %p887_p5 }
  0x86   : > { %p890_p4 = pnand %p889_p7, %p883_p3 }
  0x88   : > { %893 = shalt.err (!%p890_p4)
}
  0x89   : > { %721 = dma.vmem_to_hbm [thread:$0]  (%p1474_p0), %s1290_s27, 64, %s1288_s17, %s1313_s22   ;;  %423 = vst [vmem:[%s1262_s30] sm:$0xf] %v422_v33 }
  0x8a   : > { %s894_s29 = scalar_lea.vmem %s1280_s28, 64  ;;  %s1050_s11 = smov [#allocation10]  }
  0x8b   : > { %p895_p10 = scmp.ne.s32.totalorder %s1280_s28, %s894_s29  ;;  %s898_s12 = sshll.u32 %s1050_s11, 4  ;;  %s899_s12 = int_to_ptr.vmem [resolvable:$false] %s898_s12 }
  0x8c   : > { %s900_s24 = scalar_lea.vmem %s899_s12, 128  ;;  %p901_p2 = scmp.lt.s32.totalorder %s1280_s28, %s899_s12 }
  0x8d   : > { %p896_p12 = pnand %p895_p10, %p1474_p0  ;;  %p902_p9 = scmp.lt.s32.totalorder %s900_s24, %s894_s29 }
  0x8f   : > { %p897_p1 = pneg %p896_p12  ;;  %p903_p11 = por %p902_p9, %p901_p2 }
  0x91   : > { %p904_p3 = pnand %p903_p11, %p897_p1 }
  0x93   : > { %907 = shalt.err (!%p904_p3)
}
  0x94   : > { %s908_s30 = scalar_lea.hbm %s1297_s0, 64  ;;  %s912_s26 = scalar_lea.hbm %s1450_s4, 128 }
  0x95   : > { %p909_p6 = scmp.ne.s32.totalorder %s1297_s0, %s908_s30  ;;  %p913_p8 = scmp.lt.u32.totalorder %s1297_s0, %s1450_s4 }
  0x96   : > { %p914_p7 = scmp.lt.u32.totalorder %s912_s26, %s908_s30  ;;  %p916_p10 = scmp.lt.u32.totalorder %s908_s30, %s1297_s0 }
  0x97   : > { %p910_p13 = pnand %p909_p6, %p1474_p0 }
  0x98   : > { %p915_p4 = por %p914_p7, %p913_p8 }
  0x99   : > { %p911_p5 = pneg %p910_p13 }
  0x9a   : > { %p917_p12 = por %p916_p10, %p915_p4 }
  0x9c   : > { %p918_p1 = pnand %p917_p12, %p911_p5 }
  0x9e   : > { %921 = shalt.err (!%p918_p1)
}
  0x9f   : > { %722 = dma.vmem_to_hbm [thread:$0]  (%p1474_p0), %s1280_s28, 64, %s1297_s0, %s1313_s22   ;;  %v366_v36 = vmax.f32 %v1292_v30, %v365_v34  ;;  %v372_v37 = vrot.slane %v1308_v35, 1 }
  0xa0   : > { %s439_s25 = scalar_lea.sflag [#allocation12], %s1237_s16  ;;  %s922_s10 = scalar_lea.vmem %s1305_s15, 64 }
  0xa1   : > { %p923_p2 = scmp.ne.s32.totalorder %s1305_s15, %s922_s10  ;;  %s1051_s29 = smov [#allocation11]  }
  0xa2   : > { %s926_s11 = sshll.u32 %s1051_s29, 4  ;;  %s927_s11 = int_to_ptr.vmem [resolvable:$false] %s926_s11 }
  0xa3   : > { %p924_p9 = pnand %p923_p2, %p1474_p0  ;;  %s928_s12 = scalar_lea.vmem %s927_s11, 128 }
  0xa4   : > { %p929_p3 = scmp.lt.s32.totalorder %s1305_s15, %s927_s11  ;;  %p930_p6 = scmp.lt.s32.totalorder %s928_s12, %s922_s10 }
  0xa5   : > { %p925_p11 = pneg %p924_p9 }
  0xa6   : > { %p931_p13 = por %p930_p6, %p929_p3 }
  0xa8   : > { %p932_p5 = pnand %p931_p13, %p925_p11 }
  0xaa   : > { %935 = shalt.err (!%p932_p5)
}
  0xab   : > { %s936_s22 = scalar_lea.hbm %s1303_s1, 64  ;;  %s940_s24 = scalar_lea.hbm %s1451_s5, 128 }
  0xac   : > { %p937_p8 = scmp.ne.s32.totalorder %s1303_s1, %s936_s22  ;;  %p941_p10 = scmp.lt.u32.totalorder %s1303_s1, %s1451_s5 }
  0xad   : > { %p942_p12 = scmp.lt.u32.totalorder %s940_s24, %s936_s22  ;;  %p944_p2 = scmp.lt.u32.totalorder %s936_s22, %s1303_s1 }
  0xae   : > { %p938_p7 = pnand %p937_p8, %p1474_p0 }
  0xaf   : > { %p943_p1 = por %p942_p12, %p941_p10 }
  0xb0   : > { %p939_p4 = pneg %p938_p7 }
  0xb1   : > { %p945_p9 = por %p944_p2, %p943_p1 }
  0xb3   : > { %p946_p11 = pnand %p945_p9, %p939_p4 }
  0xb5   : > { %949 = shalt.err (!%p946_p11)
}
  0xb6   : > { %723 = dma.vmem_to_hbm [thread:$0]  (%p1474_p0), %s1305_s15, 64, %s1303_s1, %s439_s25   ;;  %v373_v38 = vmax.f32 %v1308_v35, %v372_v37  ;;  %v404_v0 = vld [vmem:[%s1253_s14] sm:$0x1] }
  0xb7   : > { %s708_s1 = sshll.u32 %s1036_s21, 4  ;;  %s452_s15 = sshll.u32 %s1253_s14, 4  ;;  %s1396_s15 = int_to_ptr.vmem [resolvable:$true] %s452_s15 }
  0xb8   : > { %v376_v39 = vcombine.low %v366_v36, %v373_v38  ;;  %s1394_s9 = scalar_lea.hbm %s1448_s2, %s708_s1  ;;  %s425_s13 = scalar_lea.sflag [#allocation4], %s1237_s16 }
  0xb9   : > { %s950_s25 = scalar_lea.vmem %s1396_s15, 16  ;;  %s1052_s21 = smov [#allocation7]  }
  0xba   : > { %v378_v40 = vsub.f32 %v1265_v5, %v376_v39  ;;  %p951_p3 = scmp.ne.s32.totalorder %s1396_s15, %s950_s25  ;;  %s954_s10 = sshll.u32 %s1052_s21, 4  ;;  %s955_s10 = int_to_ptr.vmem [resolvable:$false] %s954_s10 }
  0xbb   : > { %s956_s29 = scalar_lea.vmem %s955_s10, 32  ;;  %p957_p5 = scmp.lt.s32.totalorder %s1396_s15, %s955_s10 }
  0xbc   : > { %v379_v41 = vmul.f32 1.442695, %v378_v40  ;;  %p952_p6 = pnand %p951_p3, %p1474_p0  ;;  %p958_p8 = scmp.lt.s32.totalorder %s956_s29, %s950_s25 }
  0xbe   : > { %800 = vpow2.f32 %v379_v41  ;;  %p953_p13 = pneg %p952_p6  ;;  %p959_p7 = por %p958_p8, %p957_p5 }
  0xc0   : > { %p960_p4 = pnand %p959_p7, %p953_p13 }
  0xc8   : > { %v801_v42 = vpop.eup %800 }
  0xc9   : > { %v382_v43 = vcombine.high %v801_v42, %v801_v42  ;;  %v384_v44 = vsel %vm359_vm0, %v801_v42, 0.0 }
  0xca   : > { %v385_v45 = vrot.slane %v384_v44, 4 }
  0xcb   : > { %v391_v46 = vsel %vm359_vm0, %v382_v43, 0.0 }
  0xcc   : > { %v386_v47 = vadd.f32 %v385_v45, %v384_v44  ;;  %v392_v48 = vrot.slane %v391_v46, 4 }
  0xce   : > { %v387_v49 = vrot.slane %v386_v47, 2  ;;  %v393_v50 = vadd.f32 %v392_v48, %v391_v46 }
  0xd0   : > { %v388_v51 = vadd.f32 %v387_v49, %v386_v47  ;;  %v394_v52 = vrot.slane %v393_v50, 2 }
  0xd2   : > { %v389_v53 = vrot.slane %v388_v51, 1  ;;  %v395_v54 = vadd.f32 %v394_v52, %v393_v50 }
  0xd4   : > { %v390_v55 = vadd.f32 %v389_v53, %v388_v51  ;;  %v396_v56 = vrot.slane %v395_v54, 1 }
  0xd6   : > { %v397_v57 = vadd.f32 %v396_v56, %v395_v54  ;;  %802 = vlog2.f32 %v390_v55 }
  0xd8   : > { %804 = vlog2.f32 %v397_v57 }
  0xe0   : > { %v803_v58 = vpop.eup %802 }
  0xe1   : > { %v399_v59 = vmul.f32 0.6931472, %v803_v58 }
  0xe2   : > { %v805_v60 = vpop.eup %804 }
  0xe3   : > { %v401_v61 = vmul.f32 0.6931472, %v805_v60  ;;  %v402_v62 = vadd.f32 %v399_v59, %v366_v36 }
  0xe5   : > { %v403_v63 = vadd.f32 %v401_v61, %v373_v38 }
  0xe7   : > { %v405_v1 = vadd.f32 %v403_v63, %v402_v62 }
  0xe9   : > { %v406_v2 = vadd.f32 %v405_v1, %v404_v0 }
  0xeb   : > { %407 = vst [vmem:[%s1253_s14] sm:$0x1] %v406_v2 }
  0xec   : > { %963 = shalt.err (!%p960_p4)
}
  0xed   : > { %s964_s16 = scalar_lea.hbm %s1394_s9, 16  ;;  %s968_s12 = scalar_lea.hbm %s1448_s2, 32 }
  0xee   : > { %p965_p10 = scmp.ne.s32.totalorder %s1394_s9, %s964_s16  ;;  %p969_p2 = scmp.lt.u32.totalorder %s1394_s9, %s1448_s2 }
  0xef   : > { %p970_p9 = scmp.lt.u32.totalorder %s968_s12, %s964_s16  ;;  %p972_p3 = scmp.lt.u32.totalorder %s964_s16, %s1394_s9 }
  0xf0   : > { %p966_p12 = pnand %p965_p10, %p1474_p0 }
  0xf1   : > { %p971_p11 = por %p970_p9, %p969_p2 }
  0xf2   : > { %p967_p1 = pneg %p966_p12 }
  0xf3   : > { %p973_p6 = por %p972_p3, %p971_p11 }
  0xf5   : > { %p974_p13 = pnand %p973_p6, %p967_p1 }
  0xf7   : > { %977 = shalt.err (!%p974_p13)
}
  0xf8   : > { %720 = dma.vmem_to_hbm [thread:$0]  (%p1474_p0), %s1396_s15, 16, %s1394_s9, %s425_s13  }
  0xf9 PF: > { %s503_s0 = sand.u32 1, %s1024_s18   ;;  %p1475_p5 = scmp.ne.s32.totalorder %s1464_s8, 0 }
  0xfa   : > { %p1476_p8 = scmp.ge.s32.totalorder %s1044_s23, 2  ;;  %s504_s24 = scalar_lea.sflag [#allocation4], %s503_s0 }
  0xfc   : > { %p736_p7 = pnand %p1476_p8, %p1475_p5 }
  0xfe   : > { %1011 = dma.done.wait (!%p736_p7), %s504_s24, 16  }
  0xff   : > { %1013 = vsyncadd (!%p736_p7), %s504_s24, 4294967280  ;;  %s1477_s30 = sadd.s32 4294967294, %s1044_s23  }
 0x100   : > { %s511_s27 = sand.u32 1, %s1477_s30  }
 0x101   : > { %s512_s1 = scalar_lea.sflag [#allocation9], %s511_s27 }
 0x102   : > { %1015 = dma.done.wait (!%p736_p7), %s512_s1, 128  }
 0x103   : > { %1017 = vsyncadd (!%p736_p7), %s512_s1, 4294967168  ;;  %s530_s6 = scalar_lea.sflag [#allocation12], %s503_s0 }
 0x104   : > { %1019 = dma.done.wait (!%p736_p7), %s530_s6, 64  }
 0x105   : > { %1021 = vsyncadd (!%p736_p7), %s530_s6, 4294967232  ;;  %s31_s23 = sadd.s32 1, %s1044_s23   ;;  %s1478_s21 = sld [smem:[#allocation18_spill]] }
 0x106   : > { %p28_p0 = scmp.ge.s32.totalorder %s31_s23, 4   ;;  %s1479_s22 = sld [smem:[#allocation19_spill]] }
 0x107   : > { %s1480_s18 = smov %s1028_s19  ;;  %s1481_s19 = smov %s1032_s20 }
 0x108   : > { %s1482_s20 = smov %s1145_s7  ;;  %30 = sbr.rel (!%p28_p0) target bundleno = 15 (0xf), region = 139 }
 0x10f   :  { %535 = vsyncpa [#allocation3], 1 }
 0x110   :  { %537 = vsyncpa [#allocation3 + $0x1], 1 }
 0x111   :  { %538 = vsyncpa [#allocation6], 1 }
 0x112   :  { %540 = vsyncpa [#allocation6 + $0x1], 1 }
 0x113   :  { %541 = vsyncpa [#allocation4], 1 }
 0x114   :  { %543 = vsyncpa [#allocation4 + $0x1], 1 }
 0x115   :  { %544 = vsyncpa [#allocation9], 1 }
 0x116   :  { %546 = vsyncpa [#allocation9 + $0x1], 1 }
 0x117   :  { %547 = vsyncpa [#allocation12], 1 }
 0x118   :  { %549 = vsyncpa [#allocation12 + $0x1], 1 }

</bundles_post_ra>
